<compile_context>
chip_gen: v5e
topology: v5e:2x2
jax: 0.10.0
libtpu: 0.0.40
codegen_flags: <defaults>
</compile_context>

<pallas_src>
import jax
import jax.numpy as jnp
from jax.experimental import pallas as pl
from jax.experimental.pallas import tpu as pltpu

TEMP_INFO = 0.07
TEMP_CLIP = 0.1
MARGIN_TRIPLET = 0.3
WEIGHTS = (1.0, 1.0, 1.0)
EPS = 1e-12          # F.normalize eps
_BIG = 1e30          # finite sentinel for masked negatives (acts like +inf)


def _l2_normalize(x):
    # x / max(||x||, eps)  ==  x * rsqrt(max(||x||^2, eps^2))
    ss = jnp.sum(x * x, axis=-1, keepdims=True)
    return x * jax.lax.rsqrt(jnp.maximum(ss, EPS * EPS))


def _combined_loss_kernel(img_ref, txt_hbm_ref, lab_row_ref, lab_col_ref,
                          out_ref,
                          txt_n_ref, copy_sem,
                          col_e_info, col_e_clip,
                          acc_row_info, acc_row_clip, acc_diag_sim, acc_trip):
    i = pl.program_id(0)
    nb = pl.num_programs(0)
    B = txt_n_ref.shape[0]
    tq = img_ref.shape[0]

    @pl.when(i == 0)
    def _init():
        # Load + normalize the full text matrix once; reused by every row block.
        cp = pltpu.make_async_copy(txt_hbm_ref, txt_n_ref, copy_sem)
        cp.start()
        cp.wait()
        txt_n_ref[...] = _l2_normalize(txt_n_ref[...])
        col_e_info[...] = jnp.zeros_like(col_e_info)
        col_e_clip[...] = jnp.zeros_like(col_e_clip)
        acc_row_info[...] = jnp.zeros_like(acc_row_info)
        acc_row_clip[...] = jnp.zeros_like(acc_row_clip)
        acc_diag_sim[...] = jnp.zeros_like(acc_diag_sim)
        acc_trip[...] = jnp.zeros_like(acc_trip)

    img_n = _l2_normalize(img_ref[...].astype(jnp.float32))          # (tq, D)
    txt_n = txt_n_ref[...]                                            # (B, D), normalized

    # NT contraction on the MXU — no materialized (D, B) transpose.
    sim = jax.lax.dot_general(img_n, txt_n, (((1,), (1,)), ((), ())),
                              preferred_element_type=jnp.float32)     # (tq, B)

    # Diagonal of the global similarity matrix for this block: cheap rowwise dot
    # against the matching rows of the already-normalized resident text.
    start = pl.multiple_of(i * tq, tq)
    txt_blk = txt_n_ref[pl.ds(start, tq), :]                          # (tq, D)
    diag_sim = jnp.sum(img_n * txt_blk, axis=-1, keepdims=True)       # (tq, 1)
    acc_diag_sim[...] += jnp.sum(diag_sim, keepdims=True)             # shared by both temps

    def accumulate_ce(temp, col_ref, row_acc):
        inv_t = 1.0 / temp
        # |sim| <= 1 after normalization -> fixed max m = 1/T; one exp per temp.
        e = jnp.exp(sim * inv_t - inv_t)                              # (tq, B)
        row_lse = inv_t + jnp.log(jnp.sum(e, axis=1, keepdims=True))  # (tq, 1)
        row_acc[...] += jnp.sum(row_lse, keepdims=True)               # (1, 1)
        col_ref[...] += jnp.sum(e, axis=0, keepdims=True)             # (1, B)

    accumulate_ce(TEMP_INFO, col_e_info, acc_row_info)
    accumulate_ce(TEMP_CLIP, col_e_clip, acc_row_clip)

    # Triplet (hard negative mining): dist^2 = 2 - 2*sim on normalized features,
    # so the MXU similarity block is reused; sqrt only on the (tq, 1) minima.
    dist_sq = jnp.maximum(2.0 - 2.0 * sim, 0.0)                       # (tq, B)
    same_label = lab_col_ref[...] == lab_row_ref[...]                 # (tq, B)
    neg_sq = jnp.min(jnp.where(same_label, _BIG, dist_sq),
                     axis=1, keepdims=True)                           # (tq, 1)
    pos_d = jnp.sqrt(jnp.maximum(2.0 - 2.0 * diag_sim, 0.0))          # (tq, 1)
    neg_d = jnp.sqrt(neg_sq)                                          # (tq, 1)
    acc_trip[...] += jnp.sum(jnp.maximum(pos_d - neg_d + MARGIN_TRIPLET, 0.0),
                             keepdims=True)

    @pl.when(i == nb - 1)
    def _finalize():
        inv_b = 1.0 / float(B)
        diag_info = acc_diag_sim[...] * (1.0 / TEMP_INFO)             # sum of diag logits
        diag_clip = acc_diag_sim[...] * (1.0 / TEMP_CLIP)
        col_lse_i = (1.0 / TEMP_INFO) + jnp.log(col_e_info[...])      # (1, B)
        col_lse_c = (1.0 / TEMP_CLIP) + jnp.log(col_e_clip[...])
        row_loss_i = acc_row_info[...] - diag_info
        row_loss_c = acc_row_clip[...] - diag_clip
        col_loss_i = jnp.sum(col_lse_i, keepdims=True) - diag_info
        col_loss_c = jnp.sum(col_lse_c, keepdims=True) - diag_clip
        info = 0.5 * (row_loss_i + col_loss_i) * inv_b                # (1, 1)
        clip = 0.5 * (row_loss_c + col_loss_c) * inv_b
        trip = acc_trip[...] * inv_b
        total = WEIGHTS[0] * info + WEIGHTS[1] * clip + WEIGHTS[2] * trip
        lane = jax.lax.broadcasted_iota(jnp.int32, (1, 4), 1)
        out_ref[...] = jnp.where(lane == 0, info,
                       jnp.where(lane == 1, clip,
                       jnp.where(lane == 2, trip, total)))


def _pick_row_block(b):
    if b <= 256:
        return b
    for t in (256, 128, 64, 32, 16, 8):   # MXU-aligned first
        if b % t == 0:
            return t
    # TODO(synk): large B not divisible by 8 needs a masked last block; the
    # full-B fallback below double-buffers a (B, D) image block (VMEM-heavy).
    return b


def _vmem_limit_bytes(b, d, tq):
    f32 = 4
    need = (b * d * f32                      # resident normalized text scratch
            + 2 * tq * d * f32               # double-buffered image block
            + 2 * 8 * max(b, 128) * f32      # column exp-sum scratches (sublane-padded)
            + 6 * tq * max(b, 128) * f32     # live (tq, B) temporaries (sim/e/dist/mask)
            + (8 << 20))                     # compiler-internal headroom
    try:
        cap = int(pltpu.get_tpu_info().vmem_capacity_bytes)
    except Exception:
        cap = 64 * 1024 * 1024               # v7x per-TC physical; safe everywhere
    return int(min(max(need, 32 << 20), int(cap * 0.85)))


def combined_loss(image_features, text_features, labels):
    """image_features, text_features: (B, D); labels: (B,) int."""
    B, D = image_features.shape
    tq = _pick_row_block(B)
    nb = B // tq

    img = image_features.astype(jnp.float32)
    txt = text_features.astype(jnp.float32)
    lab = labels.astype(jnp.int32)
    lab_row = lab.reshape(1, B)
    lab_col = lab.reshape(B, 1)

    out = pl.pallas_call(
        _combined_loss_kernel,
        out_shape=jax.ShapeDtypeStruct((1, 4), jnp.float32),
        grid=(nb,),
        in_specs=[
            pl.BlockSpec((tq, D), lambda i: (i, 0)),   # image row block (pipelined)
            pl.BlockSpec(memory_space=pl.ANY),         # text: raw ref, DMA'd once
            pl.BlockSpec((1, B), lambda i: (0, 0)),    # labels as a lane row
            pl.BlockSpec((tq, 1), lambda i: (i, 0)),   # labels for block rows
        ],
        out_specs=pl.BlockSpec((1, 4), lambda i: (0, 0)),
        scratch_shapes=[
            pltpu.VMEM((B, D), jnp.float32),    # normalized text (single resident copy)
            pltpu.SemaphoreType.DMA(()),        # semaphore for the one-time text DMA
            pltpu.VMEM((1, B), jnp.float32),    # column exp-sums (info temperature)
            pltpu.VMEM((1, B), jnp.float32),    # column exp-sums (clip temperature)
            pltpu.VMEM((1, 1), jnp.float32),    # row-direction LSE sum (info)
            pltpu.VMEM((1, 1), jnp.float32),    # row-direction LSE sum (clip)
            pltpu.VMEM((1, 1), jnp.float32),    # diagonal-similarity sum (shared)
            pltpu.VMEM((1, 1), jnp.float32),    # triplet hinge sum
        ],
        compiler_params=pltpu.CompilerParams(
            # Column stats / scalar sums are accumulated across row blocks, so
            # this axis is a reduction axis.
            # TODO(synk): for v7x 2-TC use, restructure to per-block partial
            # outputs reduced in the wrapper so this axis can be "parallel".
            dimension_semantics=("arbitrary",),
            vmem_limit_bytes=_vmem_limit_bytes(B, D, tq)),
    )(img, txt, lab_row, lab_col)

    return {'info_nce_loss': out[0, 0],
            'clip_loss': out[0, 1],
            'triplet_loss': out[0, 2],
            'total_loss': out[0, 3]}


def _reference(image_features, text_features, labels):
    """Pure-JAX reference mirroring the PyTorch module (dist not initialized)."""
    def normalize(x):
        return x / jnp.maximum(jnp.linalg.norm(x, axis=-1, keepdims=True), EPS)

    img_n = normalize(image_features)
    txt_n = normalize(text_features)
    sim = img_n @ txt_n.T
    B = img_n.shape[0]
    idx = jnp.arange(B)

    def ce(logits):
        return jnp.mean(jax.nn.logsumexp(logits, axis=1) - logits[idx, idx])

    info = 0.5 * (ce(sim / TEMP_INFO) + ce((sim / TEMP_INFO).T))
    clip = 0.5 * (ce(sim / TEMP_CLIP) + ce((sim / TEMP_CLIP).T))

    diff = img_n[:, None, :] - txt_n[None, :, :]
    dmat = jnp.sqrt(jnp.maximum(jnp.sum(diff * diff, -1), 0.0))
    pos = jnp.diag(dmat)
    mask = labels[:, None] == labels[None, :]
    neg = jnp.min(jnp.where(mask, jnp.inf, dmat), axis=1)
    trip = jnp.mean(jnp.maximum(pos - neg + MARGIN_TRIPLET, 0.0))

    total = WEIGHTS[0] * info + WEIGHTS[1] * clip + WEIGHTS[2] * trip
    return info, clip, trip, total


if __name__ == "__main__":
    B, D = 8, 32
    key = jax.random.PRNGKey(0)
    k1, k2, k3 = jax.random.split(key, 3)
    image_features = jax.random.normal(k1, (B, D), dtype=jnp.float32)
    text_features = jax.random.normal(k2, (B, D), dtype=jnp.float32)
    labels = jax.random.randint(k3, (B,), 0, 4, dtype=jnp.int32)

    out = combined_loss(image_features, text_features, labels)
    jax.block_until_ready(out)

    ref_info, ref_clip, ref_trip, ref_total = _reference(
        image_features, text_features, labels)
    assert jnp.allclose(out['info_nce_loss'], ref_info, atol=1e-3, rtol=1e-3)
    assert jnp.allclose(out['clip_loss'], ref_clip, atol=1e-3, rtol=1e-3)
    assert jnp.allclose(out['triplet_loss'], ref_trip, atol=1e-3, rtol=1e-3)
    assert jnp.allclose(out['total_loss'], ref_total, atol=1e-3, rtol=1e-3)

    print("KERNEL_OK")
</pallas_src>

<mosaic_0001>
module attributes {stable_mosaic.version = 11 : i64} {
  func.func @_combined_loss_kernel(%arg0: i32, %arg1: memref<8x32xf32, #tpu.memory_space<vmem>>, %arg2: memref<8x32xf32, #tpu.memory_space<any>>, %arg3: memref<1x8xi32, #tpu.memory_space<vmem>>, %arg4: memref<8x1xi32, #tpu.memory_space<vmem>>, %arg5: memref<1x4xf32, #tpu.memory_space<vmem>>, %arg6: memref<8x32xf32, #tpu.memory_space<vmem>>, %arg7: memref<!tpu.dma_semaphore, #tpu.memory_space<semaphore_mem>>, %arg8: memref<1x8xf32, #tpu.memory_space<vmem>>, %arg9: memref<1x8xf32, #tpu.memory_space<vmem>>, %arg10: memref<1x1xf32, #tpu.memory_space<vmem>>, %arg11: memref<1x1xf32, #tpu.memory_space<vmem>>, %arg12: memref<1x1xf32, #tpu.memory_space<vmem>>, %arg13: memref<1x1xf32, #tpu.memory_space<vmem>>) attributes {dimension_semantics = [#tpu.dimension_semantics<arbitrary>], iteration_bounds = array<i64: 1>, scalar_prefetch = 0 : i64, scratch_operands = 8 : i64, tpu.core_type = #tpu.core_type<tc>, window_params = [{transform_indices = @transform_0, window_bounds = array<i64: 8, 32>}, {}, {pipeline_mode = #tpu.pipeline_mode<synchronous>, transform_indices = @transform_2, window_bounds = array<i64: 1, 8>}, {transform_indices = @transform_3, window_bounds = array<i64: 8, 1>}, {pipeline_mode = #tpu.pipeline_mode<synchronous>, transform_indices = @transform_4, window_bounds = array<i64: 1, 4>}]} {
    %c0_i32 = arith.constant 0 : i32
    %0 = arith.cmpi eq, %arg0, %c0_i32 : i32
    %1 = arith.extui %0 : i1 to i32
    %c0_i32_0 = arith.constant 0 : i32
    %2 = arith.cmpi ne, %1, %c0_i32_0 : i32
    scf.if %2 {
      tpu.enqueue_dma source(%arg2 : memref<8x32xf32, #tpu.memory_space<any>>) target(%arg6 : memref<8x32xf32, #tpu.memory_space<vmem>>) target_semaphore(%arg7 : memref<!tpu.dma_semaphore, #tpu.memory_space<semaphore_mem>>)
      tpu.wait_dma2 semaphore(%arg7 : memref<!tpu.dma_semaphore, #tpu.memory_space<semaphore_mem>>) src(%arg2 : memref<8x32xf32, #tpu.memory_space<any>>) dst(%arg6 : memref<8x32xf32, #tpu.memory_space<vmem>>)
      %c0_62 = arith.constant 0 : index
      %c0_63 = arith.constant 0 : index
      %114 = vector.load %arg6[%c0_62, %c0_63] : memref<8x32xf32, #tpu.memory_space<vmem>>, vector<8x32xf32>
      %115 = arith.mulf %114, %114 : vector<8x32xf32>
      %cst_64 = arith.constant dense<0.000000e+00> : vector<8xf32>
      %116 = vector.multi_reduction <add>, %115, %cst_64 [1] : vector<8x32xf32> to vector<8xf32>
      %117 = vector.shape_cast %116 : vector<8xf32> to vector<8x1xf32>
      %cst_65 = arith.constant 1.000000e-24 : f32
      %118 = vector.broadcast %cst_65 : f32 to vector<8x1xf32>
      %119 = arith.maximumf %117, %118 : vector<8x1xf32>
      %120 = math.rsqrt %119 : vector<8x1xf32>
      %121 = vector.broadcast %120 : vector<8x1xf32> to vector<8x32xf32>
      %122 = arith.mulf %114, %121 : vector<8x32xf32>
      %c0_66 = arith.constant 0 : index
      %c0_67 = arith.constant 0 : index
      %123 = vector.load %arg6[%c0_66, %c0_67] : memref<8x32xf32, #tpu.memory_space<vmem>>, vector<8x32xf32>
      tpu.vector_store %arg6[%c0_66, %c0_67], %122 {strides = array<i32>} : memref<8x32xf32, #tpu.memory_space<vmem>>, vector<8x32xf32>,
      %cst_68 = arith.constant 0.000000e+00 : f32
      %124 = vector.broadcast %cst_68 : f32 to vector<1x8xf32>
      %c0_69 = arith.constant 0 : index
      %c0_70 = arith.constant 0 : index
      %125 = vector.load %arg8[%c0_69, %c0_70] : memref<1x8xf32, #tpu.memory_space<vmem>>, vector<1x8xf32>
      tpu.vector_store %arg8[%c0_69, %c0_70], %124 {strides = array<i32>} : memref<1x8xf32, #tpu.memory_space<vmem>>, vector<1x8xf32>,
      %cst_71 = arith.constant 0.000000e+00 : f32
      %126 = vector.broadcast %cst_71 : f32 to vector<1x8xf32>
      %c0_72 = arith.constant 0 : index
      %c0_73 = arith.constant 0 : index
      %127 = vector.load %arg9[%c0_72, %c0_73] : memref<1x8xf32, #tpu.memory_space<vmem>>, vector<1x8xf32>
      tpu.vector_store %arg9[%c0_72, %c0_73], %126 {strides = array<i32>} : memref<1x8xf32, #tpu.memory_space<vmem>>, vector<1x8xf32>,
      %cst_74 = arith.constant 0.000000e+00 : f32
      %128 = vector.broadcast %cst_74 : f32 to vector<1x1xf32>
      %c0_75 = arith.constant 0 : index
      %c0_76 = arith.constant 0 : index
      %129 = vector.load %arg10[%c0_75, %c0_76] : memref<1x1xf32, #tpu.memory_space<vmem>>, vector<1x1xf32>
      tpu.vector_store %arg10[%c0_75, %c0_76], %128 {strides = array<i32>} : memref<1x1xf32, #tpu.memory_space<vmem>>, vector<1x1xf32>,
      %cst_77 = arith.constant 0.000000e+00 : f32
      %130 = vector.broadcast %cst_77 : f32 to vector<1x1xf32>
      %c0_78 = arith.constant 0 : index
      %c0_79 = arith.constant 0 : index
      %131 = vector.load %arg11[%c0_78, %c0_79] : memref<1x1xf32, #tpu.memory_space<vmem>>, vector<1x1xf32>
      tpu.vector_store %arg11[%c0_78, %c0_79], %130 {strides = array<i32>} : memref<1x1xf32, #tpu.memory_space<vmem>>, vector<1x1xf32>,
      %cst_80 = arith.constant 0.000000e+00 : f32
      %132 = vector.broadcast %cst_80 : f32 to vector<1x1xf32>
      %c0_81 = arith.constant 0 : index
      %c0_82 = arith.constant 0 : index
      %133 = vector.load %arg12[%c0_81, %c0_82] : memref<1x1xf32, #tpu.memory_space<vmem>>, vector<1x1xf32>
      tpu.vector_store %arg12[%c0_81, %c0_82], %132 {strides = array<i32>} : memref<1x1xf32, #tpu.memory_space<vmem>>, vector<1x1xf32>,
      %cst_83 = arith.constant 0.000000e+00 : f32
      %134 = vector.broadcast %cst_83 : f32 to vector<1x1xf32>
      %c0_84 = arith.constant 0 : index
      %c0_85 = arith.constant 0 : index
      %135 = vector.load %arg13[%c0_84, %c0_85] : memref<1x1xf32, #tpu.memory_space<vmem>>, vector<1x1xf32>
      tpu.vector_store %arg13[%c0_84, %c0_85], %134 {strides = array<i32>} : memref<1x1xf32, #tpu.memory_space<vmem>>, vector<1x1xf32>,
    } else {
    }
    %c0 = arith.constant 0 : index
    %c0_1 = arith.constant 0 : index
    %3 = vector.load %arg1[%c0, %c0_1] : memref<8x32xf32, #tpu.memory_space<vmem>>, vector<8x32xf32>
    %4 = arith.mulf %3, %3 : vector<8x32xf32>
    %cst = arith.constant dense<0.000000e+00> : vector<8xf32>
    %5 = vector.multi_reduction <add>, %4, %cst [1] : vector<8x32xf32> to vector<8xf32>
    %6 = vector.shape_cast %5 : vector<8xf32> to vector<8x1xf32>
    %cst_2 = arith.constant 1.000000e-24 : f32
    %7 = vector.broadcast %cst_2 : f32 to vector<8x1xf32>
    %8 = arith.maximumf %6, %7 : vector<8x1xf32>
    %9 = math.rsqrt %8 : vector<8x1xf32>
    %10 = vector.broadcast %9 : vector<8x1xf32> to vector<8x32xf32>
    %11 = arith.mulf %3, %10 : vector<8x32xf32>
    %c0_3 = arith.constant 0 : index
    %c0_4 = arith.constant 0 : index
    %12 = vector.load %arg6[%c0_3, %c0_4] : memref<8x32xf32, #tpu.memory_space<vmem>>, vector<8x32xf32>
    %cst_5 = arith.constant dense<0.000000e+00> : vector<8x8xf32>
    %13 = tpu.matmul %11, %12, %cst_5 {dimension_numbers = #tpu.dot_dimension_numbers<[1], [1], [0], [0], [0, 0, 1, 0], [], []>} : vector<8x32xf32>, vector<8x32xf32>, vector<8x8xf32> -> vector<8x8xf32>
    %c8_i32 = arith.constant 8 : i32
    %14 = arith.muli %arg0, %c8_i32 : i32
    %15 = tpu.assume_multiple %14, 8 : i32
    %16 = arith.index_cast %15 : i32 to index
    %c0_6 = arith.constant 0 : index
    %17 = vector.load %arg6[%16, %c0_6] : memref<8x32xf32, #tpu.memory_space<vmem>>, vector<8x32xf32>
    %18 = arith.mulf %11, %17 : vector<8x32xf32>
    %cst_7 = arith.constant dense<0.000000e+00> : vector<8xf32>
    %19 = vector.multi_reduction <add>, %18, %cst_7 [1] : vector<8x32xf32> to vector<8xf32>
    %20 = vector.shape_cast %19 : vector<8xf32> to vector<8x1xf32>
    %c0_8 = arith.constant 0 : index
    %c0_9 = arith.constant 0 : index
    %21 = vector.load %arg12[%c0_8, %c0_9] : memref<1x1xf32, #tpu.memory_space<vmem>>, vector<1x1xf32>
    %22 = vector.shape_cast %20 : vector<8x1xf32> to vector<1x8x1xf32>
    %cst_10 = arith.constant dense<0.000000e+00> : vector<1xf32>
    %23 = vector.multi_reduction <add>, %22, %cst_10 [1, 2] : vector<1x8x1xf32> to vector<1xf32>
    %24 = vector.shape_cast %23 : vector<1xf32> to vector<1x1x1xf32>
    %25 = vector.extract %24[0, 0, 0] : f32 from vector<1x1x1xf32>
    %26 = vector.broadcast %25 : f32 to vector<1x1xf32>
    %27 = arith.addf %21, %26 : vector<1x1xf32>
    %c0_11 = arith.constant 0 : index
    %c0_12 = arith.constant 0 : index
    %28 = vector.load %arg12[%c0_11, %c0_12] : memref<1x1xf32, #tpu.memory_space<vmem>>, vector<1x1xf32>
    tpu.vector_store %arg12[%c0_11, %c0_12], %27 {strides = array<i32>} : memref<1x1xf32, #tpu.memory_space<vmem>>, vector<1x1xf32>,
    %cst_13 = arith.constant 14.2857141 : f32
    %29 = vector.broadcast %cst_13 : f32 to vector<8x8xf32>
    %30 = arith.mulf %13, %29 : vector<8x8xf32>
    %cst_14 = arith.constant 14.2857141 : f32
    %31 = vector.broadcast %cst_14 : f32 to vector<8x8xf32>
    %32 = arith.subf %30, %31 : vector<8x8xf32>
    %33 = math.exp %32 : vector<8x8xf32>
    %cst_15 = arith.constant dense<0.000000e+00> : vector<8xf32>
    %34 = vector.multi_reduction <add>, %33, %cst_15 [1] : vector<8x8xf32> to vector<8xf32>
    %35 = vector.shape_cast %34 : vector<8xf32> to vector<8x1xf32>
    %36 = math.log %35 : vector<8x1xf32>
    %cst_16 = arith.constant 14.2857141 : f32
    %37 = vector.broadcast %cst_16 : f32 to vector<8x1xf32>
    %38 = arith.addf %37, %36 : vector<8x1xf32>
    %c0_17 = arith.constant 0 : index
    %c0_18 = arith.constant 0 : index
    %39 = vector.load %arg10[%c0_17, %c0_18] : memref<1x1xf32, #tpu.memory_space<vmem>>, vector<1x1xf32>
    %40 = vector.shape_cast %38 : vector<8x1xf32> to vector<1x8x1xf32>
    %cst_19 = arith.constant dense<0.000000e+00> : vector<1xf32>
    %41 = vector.multi_reduction <add>, %40, %cst_19 [1, 2] : vector<1x8x1xf32> to vector<1xf32>
    %42 = vector.shape_cast %41 : vector<1xf32> to vector<1x1x1xf32>
    %43 = vector.extract %42[0, 0, 0] : f32 from vector<1x1x1xf32>
    %44 = vector.broadcast %43 : f32 to vector<1x1xf32>
    %45 = arith.addf %39, %44 : vector<1x1xf32>
    %c0_20 = arith.constant 0 : index
    %c0_21 = arith.constant 0 : index
    %46 = vector.load %arg10[%c0_20, %c0_21] : memref<1x1xf32, #tpu.memory_space<vmem>>, vector<1x1xf32>
    tpu.vector_store %arg10[%c0_20, %c0_21], %45 {strides = array<i32>} : memref<1x1xf32, #tpu.memory_space<vmem>>, vector<1x1xf32>,
    %c0_22 = arith.constant 0 : index
    %c0_23 = arith.constant 0 : index
    %47 = vector.load %arg8[%c0_22, %c0_23] : memref<1x8xf32, #tpu.memory_space<vmem>>, vector<1x8xf32>
    %cst_24 = arith.constant dense<0.000000e+00> : vector<8xf32>
    %48 = vector.multi_reduction <add>, %33, %cst_24 [0] : vector<8x8xf32> to vector<8xf32>
    %49 = vector.shape_cast %48 : vector<8xf32> to vector<1x8xf32>
    %50 = arith.addf %47, %49 : vector<1x8xf32>
    %c0_25 = arith.constant 0 : index
    %c0_26 = arith.constant 0 : index
    %51 = vector.load %arg8[%c0_25, %c0_26] : memref<1x8xf32, #tpu.memory_space<vmem>>, vector<1x8xf32>
    tpu.vector_store %arg8[%c0_25, %c0_26], %50 {strides = array<i32>} : memref<1x8xf32, #tpu.memory_space<vmem>>, vector<1x8xf32>,
    %cst_27 = arith.constant 1.000000e+01 : f32
    %52 = vector.broadcast %cst_27 : f32 to vector<8x8xf32>
    %53 = arith.mulf %13, %52 : vector<8x8xf32>
    %cst_28 = arith.constant 1.000000e+01 : f32
    %54 = vector.broadcast %cst_28 : f32 to vector<8x8xf32>
    %55 = arith.subf %53, %54 : vector<8x8xf32>
    %56 = math.exp %55 : vector<8x8xf32>
    %cst_29 = arith.constant dense<0.000000e+00> : vector<8xf32>
    %57 = vector.multi_reduction <add>, %56, %cst_29 [1] : vector<8x8xf32> to vector<8xf32>
    %58 = vector.shape_cast %57 : vector<8xf32> to vector<8x1xf32>
    %59 = math.log %58 : vector<8x1xf32>
    %cst_30 = arith.constant 1.000000e+01 : f32
    %60 = vector.broadcast %cst_30 : f32 to vector<8x1xf32>
    %61 = arith.addf %60, %59 : vector<8x1xf32>
    %c0_31 = arith.constant 0 : index
    %c0_32 = arith.constant 0 : index
    %62 = vector.load %arg11[%c0_31, %c0_32] : memref<1x1xf32, #tpu.memory_space<vmem>>, vector<1x1xf32>
    %63 = vector.shape_cast %61 : vector<8x1xf32> to vector<1x8x1xf32>
    %cst_33 = arith.constant dense<0.000000e+00> : vector<1xf32>
    %64 = vector.multi_reduction <add>, %63, %cst_33 [1, 2] : vector<1x8x1xf32> to vector<1xf32>
    %65 = vector.shape_cast %64 : vector<1xf32> to vector<1x1x1xf32>
    %66 = vector.extract %65[0, 0, 0] : f32 from vector<1x1x1xf32>
    %67 = vector.broadcast %66 : f32 to vector<1x1xf32>
    %68 = arith.addf %62, %67 : vector<1x1xf32>
    %c0_34 = arith.constant 0 : index
    %c0_35 = arith.constant 0 : index
    %69 = vector.load %arg11[%c0_34, %c0_35] : memref<1x1xf32, #tpu.memory_space<vmem>>, vector<1x1xf32>
    tpu.vector_store %arg11[%c0_34, %c0_35], %68 {strides = array<i32>} : memref<1x1xf32, #tpu.memory_space<vmem>>, vector<1x1xf32>,
    %c0_36 = arith.constant 0 : index
    %c0_37 = arith.constant 0 : index
    %70 = vector.load %arg9[%c0_36, %c0_37] : memref<1x8xf32, #tpu.memory_space<vmem>>, vector<1x8xf32>
    %cst_38 = arith.constant dense<0.000000e+00> : vector<8xf32>
    %71 = vector.multi_reduction <add>, %56, %cst_38 [0] : vector<8x8xf32> to vector<8xf32>
    %72 = vector.shape_cast %71 : vector<8xf32> to vector<1x8xf32>
    %73 = arith.addf %70, %72 : vector<1x8xf32>
    %c0_39 = arith.constant 0 : index
    %c0_40 = arith.constant 0 : index
    %74 = vector.load %arg9[%c0_39, %c0_40] : memref<1x8xf32, #tpu.memory_space<vmem>>, vector<1x8xf32>
    tpu.vector_store %arg9[%c0_39, %c0_40], %73 {strides = array<i32>} : memref<1x8xf32, #tpu.memory_space<vmem>>, vector<1x8xf32>,
    %cst_41 = arith.constant 2.000000e+00 : f32
    %75 = vector.broadcast %cst_41 : f32 to vector<8x8xf32>
    %76 = arith.mulf %75, %13 : vector<8x8xf32>
    %cst_42 = arith.constant 2.000000e+00 : f32
    %77 = vector.broadcast %cst_42 : f32 to vector<8x8xf32>
    %78 = arith.subf %77, %76 : vector<8x8xf32>
    %cst_43 = arith.constant 0.000000e+00 : f32
    %79 = vector.broadcast %cst_43 : f32 to vector<8x8xf32>
    %80 = arith.maximumf %78, %79 : vector<8x8xf32>
    %c0_44 = arith.constant 0 : index
    %c0_45 = arith.constant 0 : index
    %81 = vector.load %arg4[%c0_44, %c0_45] : memref<8x1xi32, #tpu.memory_space<vmem>>, vector<8x1xi32>
    %c0_46 = arith.constant 0 : index
    %c0_47 = arith.constant 0 : index
    %82 = vector.load %arg3[%c0_46, %c0_47] : memref<1x8xi32, #tpu.memory_space<vmem>>, vector<1x8xi32>
    %83 = vector.broadcast %81 : vector<8x1xi32> to vector<8x8xi32>
    %84 = vector.broadcast %82 : vector<1x8xi32> to vector<8x8xi32>
    %85 = arith.cmpi eq, %83, %84 : vector<8x8xi32>
    %cst_48 = arith.constant 1.000000e+30 : f32
    %86 = vector.broadcast %cst_48 : f32 to vector<8x8xf32>
    %87 = arith.select %85, %86, %80 : vector<8x8xi1>, vector<8x8xf32>
    %cst_49 = arith.constant dense<0x7F800000> : vector<8xf32>
    %88 = vector.multi_reduction <minimumf>, %87, %cst_49 [1] : vector<8x8xf32> to vector<8xf32>
    %89 = vector.shape_cast %88 : vector<8xf32> to vector<8x1xf32>
    %cst_50 = arith.constant 2.000000e+00 : f32
    %90 = vector.broadcast %cst_50 : f32 to vector<8x1xf32>
    %91 = arith.mulf %90, %20 : vector<8x1xf32>
    %cst_51 = arith.constant 2.000000e+00 : f32
    %92 = vector.broadcast %cst_51 : f32 to vector<8x1xf32>
    %93 = arith.subf %92, %91 : vector<8x1xf32>
    %cst_52 = arith.constant 0.000000e+00 : f32
    %94 = vector.broadcast %cst_52 : f32 to vector<8x1xf32>
    %95 = arith.maximumf %93, %94 : vector<8x1xf32>
    %96 = math.sqrt %95 : vector<8x1xf32>
    %97 = math.sqrt %89 : vector<8x1xf32>
    %c0_53 = arith.constant 0 : index
    %c0_54 = arith.constant 0 : index
    %98 = vector.load %arg13[%c0_53, %c0_54] : memref<1x1xf32, #tpu.memory_space<vmem>>, vector<1x1xf32>
    %99 = arith.subf %96, %97 : vector<8x1xf32>
    %cst_55 = arith.constant 3.000000e-01 : f32
    %100 = vector.broadcast %cst_55 : f32 to vector<8x1xf32>
    %101 = arith.addf %99, %100 : vector<8x1xf32>
    %cst_56 = arith.constant 0.000000e+00 : f32
    %102 = vector.broadcast %cst_56 : f32 to vector<8x1xf32>
    %103 = arith.maximumf %101, %102 : vector<8x1xf32>
    %104 = vector.shape_cast %103 : vector<8x1xf32> to vector<1x8x1xf32>
    %cst_57 = arith.constant dense<0.000000e+00> : vector<1xf32>
    %105 = vector.multi_reduction <add>, %104, %cst_57 [1, 2] : vector<1x8x1xf32> to vector<1xf32>
    %106 = vector.shape_cast %105 : vector<1xf32> to vector<1x1x1xf32>
    %107 = vector.extract %106[0, 0, 0] : f32 from vector<1x1x1xf32>
    %108 = vector.broadcast %107 : f32 to vector<1x1xf32>
    %109 = arith.addf %98, %108 : vector<1x1xf32>
    %c0_58 = arith.constant 0 : index
    %c0_59 = arith.constant 0 : index
    %110 = vector.load %arg13[%c0_58, %c0_59] : memref<1x1xf32, #tpu.memory_space<vmem>>, vector<1x1xf32>
    tpu.vector_store %arg13[%c0_58, %c0_59], %109 {strides = array<i32>} : memref<1x1xf32, #tpu.memory_space<vmem>>, vector<1x1xf32>,
    %c0_i32_60 = arith.constant 0 : i32
    %111 = arith.cmpi eq, %arg0, %c0_i32_60 : i32
    %112 = arith.extui %111 : i1 to i32
    %c0_i32_61 = arith.constant 0 : i32
    %113 = arith.cmpi ne, %112, %c0_i32_61 : i32
    scf.if %113 {
      %c0_62 = arith.constant 0 : index
      %c0_63 = arith.constant 0 : index
      %114 = vector.load %arg12[%c0_62, %c0_63] : memref<1x1xf32, #tpu.memory_space<vmem>>, vector<1x1xf32>
      %cst_64 = arith.constant 14.2857141 : f32
      %115 = vector.broadcast %cst_64 : f32 to vector<1x1xf32>
      %116 = arith.mulf %114, %115 : vector<1x1xf32>
      %c0_65 = arith.constant 0 : index
      %c0_66 = arith.constant 0 : index
      %117 = vector.load %arg12[%c0_65, %c0_66] : memref<1x1xf32, #tpu.memory_space<vmem>>, vector<1x1xf32>
      %cst_67 = arith.constant 1.000000e+01 : f32
      %118 = vector.broadcast %cst_67 : f32 to vector<1x1xf32>
      %119 = arith.mulf %117, %118 : vector<1x1xf32>
      %c0_68 = arith.constant 0 : index
      %c0_69 = arith.constant 0 : index
      %120 = vector.load %arg8[%c0_68, %c0_69] : memref<1x8xf32, #tpu.memory_space<vmem>>, vector<1x8xf32>
      %121 = math.log %120 : vector<1x8xf32>
      %cst_70 = arith.constant 14.2857141 : f32
      %122 = vector.broadcast %cst_70 : f32 to vector<1x8xf32>
      %123 = arith.addf %122, %121 : vector<1x8xf32>
      %c0_71 = arith.constant 0 : index
      %c0_72 = arith.constant 0 : index
      %124 = vector.load %arg9[%c0_71, %c0_72] : memref<1x8xf32, #tpu.memory_space<vmem>>, vector<1x8xf32>
      %125 = math.log %124 : vector<1x8xf32>
      %cst_73 = arith.constant 1.000000e+01 : f32
      %126 = vector.broadcast %cst_73 : f32 to vector<1x8xf32>
      %127 = arith.addf %126, %125 : vector<1x8xf32>
      %c0_74 = arith.constant 0 : index
      %c0_75 = arith.constant 0 : index
      %128 = vector.load %arg10[%c0_74, %c0_75] : memref<1x1xf32, #tpu.memory_space<vmem>>, vector<1x1xf32>
      %129 = arith.subf %128, %116 : vector<1x1xf32>
      %c0_76 = arith.constant 0 : index
      %c0_77 = arith.constant 0 : index
      %130 = vector.load %arg11[%c0_76, %c0_77] : memref<1x1xf32, #tpu.memory_space<vmem>>, vector<1x1xf32>
      %131 = arith.subf %130, %119 : vector<1x1xf32>
      %132 = vector.shape_cast %123 : vector<1x8xf32> to vector<1x1x8xf32>
      %cst_78 = arith.constant dense<0.000000e+00> : vector<1xf32>
      %133 = vector.multi_reduction <add>, %132, %cst_78 [1, 2] : vector<1x1x8xf32> to vector<1xf32>
      %134 = vector.shape_cast %133 : vector<1xf32> to vector<1x1x1xf32>
      %135 = vector.extract %134[0, 0, 0] : f32 from vector<1x1x1xf32>
      %136 = vector.broadcast %135 : f32 to vector<1x1xf32>
      %137 = arith.subf %136, %116 : vector<1x1xf32>
      %138 = vector.shape_cast %127 : vector<1x8xf32> to vector<1x1x8xf32>
      %cst_79 = arith.constant dense<0.000000e+00> : vector<1xf32>
      %139 = vector.multi_reduction <add>, %138, %cst_79 [1, 2] : vector<1x1x8xf32> to vector<1xf32>
      %140 = vector.shape_cast %139 : vector<1xf32> to vector<1x1x1xf32>
      %141 = vector.extract %140[0, 0, 0] : f32 from vector<1x1x1xf32>
      %142 = vector.broadcast %141 : f32 to vector<1x1xf32>
      %143 = arith.subf %142, %119 : vector<1x1xf32>
      %144 = arith.addf %129, %137 : vector<1x1xf32>
      %cst_80 = arith.constant 5.000000e-01 : f32
      %145 = vector.broadcast %cst_80 : f32 to vector<1x1xf32>
      %146 = arith.mulf %145, %144 : vector<1x1xf32>
      %cst_81 = arith.constant 1.250000e-01 : f32
      %147 = vector.broadcast %cst_81 : f32 to vector<1x1xf32>
      %148 = arith.mulf %146, %147 : vector<1x1xf32>
      %149 = arith.addf %131, %143 : vector<1x1xf32>
      %cst_82 = arith.constant 5.000000e-01 : f32
      %150 = vector.broadcast %cst_82 : f32 to vector<1x1xf32>
      %151 = arith.mulf %150, %149 : vector<1x1xf32>
      %cst_83 = arith.constant 1.250000e-01 : f32
      %152 = vector.broadcast %cst_83 : f32 to vector<1x1xf32>
      %153 = arith.mulf %151, %152 : vector<1x1xf32>
      %c0_84 = arith.constant 0 : index
      %c0_85 = arith.constant 0 : index
      %154 = vector.load %arg13[%c0_84, %c0_85] : memref<1x1xf32, #tpu.memory_space<vmem>>, vector<1x1xf32>
      %cst_86 = arith.constant 1.250000e-01 : f32
      %155 = vector.broadcast %cst_86 : f32 to vector<1x1xf32>
      %156 = arith.mulf %154, %155 : vector<1x1xf32>
      %cst_87 = arith.constant 1.000000e+00 : f32
      %157 = vector.broadcast %cst_87 : f32 to vector<1x1xf32>
      %158 = arith.mulf %157, %148 : vector<1x1xf32>
      %cst_88 = arith.constant 1.000000e+00 : f32
      %159 = vector.broadcast %cst_88 : f32 to vector<1x1xf32>
      %160 = arith.mulf %159, %153 : vector<1x1xf32>
      %161 = arith.addf %158, %160 : vector<1x1xf32>
      %cst_89 = arith.constant 1.000000e+00 : f32
      %162 = vector.broadcast %cst_89 : f32 to vector<1x1xf32>
      %163 = arith.mulf %162, %156 : vector<1x1xf32>
      %164 = arith.addf %161, %163 : vector<1x1xf32>
      %165 = tpu.iota {dimensions = array<i32: 1>} : vector<1x4xi32>
      %c0_i32_90 = arith.constant 0 : i32
      %166 = vector.broadcast %c0_i32_90 : i32 to vector<1x4xi32>
      %167 = arith.cmpi eq, %165, %166 : vector<1x4xi32>
      %c1_i32 = arith.constant 1 : i32
      %168 = vector.broadcast %c1_i32 : i32 to vector<1x4xi32>
      %169 = arith.cmpi eq, %165, %168 : vector<1x4xi32>
      %c2_i32 = arith.constant 2 : i32
      %170 = vector.broadcast %c2_i32 : i32 to vector<1x4xi32>
      %171 = arith.cmpi eq, %165, %170 : vector<1x4xi32>
      %172 = vector.shape_cast %156 : vector<1x1xf32> to vector<1x1xf32>
      %173 = vector.broadcast %172 : vector<1x1xf32> to vector<1x4xf32>
      %174 = vector.shape_cast %164 : vector<1x1xf32> to vector<1x1xf32>
      %175 = vector.broadcast %174 : vector<1x1xf32> to vector<1x4xf32>
      %176 = arith.select %171, %173, %175 : vector<1x4xi1>, vector<1x4xf32>
      %177 = vector.shape_cast %153 : vector<1x1xf32> to vector<1x1xf32>
      %178 = vector.broadcast %177 : vector<1x1xf32> to vector<1x4xf32>
      %179 = arith.select %169, %178, %176 : vector<1x4xi1>, vector<1x4xf32>
      %180 = vector.shape_cast %148 : vector<1x1xf32> to vector<1x1xf32>
      %181 = vector.broadcast %180 : vector<1x1xf32> to vector<1x4xf32>
      %182 = arith.select %167, %181, %179 : vector<1x4xi1>, vector<1x4xf32>
      %c0_91 = arith.constant 0 : index
      %c0_92 = arith.constant 0 : index
      %183 = vector.load %arg5[%c0_91, %c0_92] : memref<1x4xf32, #tpu.memory_space<vmem>>, vector<1x4xf32>
      tpu.vector_store %arg5[%c0_91, %c0_92], %182 {strides = array<i32>} : memref<1x4xf32, #tpu.memory_space<vmem>>, vector<1x4xf32>,
    } else {
    }
    return
  }
  func.func @transform_0(%arg0: i32) -> (i32, i32) {
    %c0_i32 = arith.constant 0 : i32
    %c0_i32_0 = arith.constant 0 : i32
    return %arg0, %c0_i32 : i32, i32
  }
  func.func @transform_2(%arg0: i32) -> (i32, i32) {
    %c0_i32 = arith.constant 0 : i32
    %c0_i32_0 = arith.constant 0 : i32
    %c0_i32_1 = arith.constant 0 : i32
    return %c0_i32, %c0_i32_0 : i32, i32
  }
  func.func @transform_3(%arg0: i32) -> (i32, i32) {
    %c0_i32 = arith.constant 0 : i32
    %c0_i32_0 = arith.constant 0 : i32
    return %arg0, %c0_i32 : i32, i32
  }
  func.func @transform_4(%arg0: i32) -> (i32, i32) {
    %c0_i32 = arith.constant 0 : i32
    %c0_i32_0 = arith.constant 0 : i32
    %c0_i32_1 = arith.constant 0 : i32
    return %c0_i32, %c0_i32_0 : i32, i32
  }
}

</mosaic_0001>

<bundles_post_ra>
// kernel: tpu_custom_call.1
= control target key start
LH: loop header
LB: loop body
LE: loop exit
PB: predicated region body
PF: predicated region fallthrough
CT: control target
= control target key end

     0   :  { %9 = vsyncpa [#allocation11], 0  ;;  %s462_s18 = smov [#allocation2]   ;;  %s536_s0 = inlined_call_operand.vmem [shape: f32[8,32], index: 0, kind: input, shape index: {}]   ;;  %s537_s1 = inlined_call_operand.hbm [shape: f32[8,32], index: 1, kind: input, shape index: {}]   ;;  %s538_s2 = inlined_call_operand.vmem [shape: s32[1,8], index: 2, kind: input, shape index: {}]   ;;  %s539_s3 = inlined_call_operand.vmem [shape: s32[8,1], index: 3, kind: input, shape index: {}]   ;;  %s540_s4 = inlined_call_operand.hbm [shape: f32[1,4], index: 4, kind: output, shape index: {}]  }
   0x1   :  { %s27_s17 = sshll.u32 %s537_s1, 4  ;;  %s29_s19 = sshll.u32 %s462_s18, 4  ;;  %s28_s17 = int_to_ptr.hbm [resolvable:$true] %s27_s17  ;;  %s30_s19 = int_to_ptr.vmem [resolvable:$true] %s29_s19 }
   0x2   :  { %32 = dma.hbm_to_vmem [thread:$0]  %s28_s17, 128, %s30_s19, [#allocation3] }
   0x3   :  { %458 = dma.done.wait [#allocation3], 128 }
   0x4   :  { %459 = vsyncadd [#allocation3], 4294967168  ;;  %v463_v0 = vmov 0   ;;  %v36_v1 = vld [vmem:[#allocation2] sm:$0xff]  ;;  %vm38_vm0 = vcmask 261120   ;;  %vm55_vm7 = vcmask 57344  }
   0x5   :  { %386 = vset.pattern.permute.xlu1 %v463_v0  ;;  %387 = vset.pattern.permute.xlu2 %v463_v0  ;;  %v202_v2 = vld [vmem:[%s539_s3] sm:$0xff]  ;;  %v37_v3 = vmul.f32 %v36_v1, %v36_v1  ;;  %v464_v31 = vmov 0.0   ;;  %vm135_vm9 = vcmask 64512   ;;  %vm116_vm10 = vcmask 7168   ;;  %s465_s28 = smov [#allocation10]   ;;  %s350_s6 = sshll.u32 %s540_s4, 4  ;;  %s351_s6 = int_to_ptr.hbm [resolvable:$true] %s350_s6 }
   0x6   :  { %388 = vset.pattern.permute.xlu0 %v463_v0  ;;  %205 = vperm.xlu1 %386, %v202_v2   ;;  %v63_v4 = vld [vmem:[%s536_s0] sm:$0xff]  ;;  %56 = vst.msk [vmem:[#allocation4] sm:$0x1] %vm55_vm7, %v464_v31  ;;  %vm58_vm11 = vcmask 0   ;;  %s348_s29 = sshll.u32 %s465_s28, 4  ;;  %s349_s29 = int_to_ptr.vmem [resolvable:$true] %s348_s29 }
   0x7   :  { %v39_v5 = vsel %vm38_vm0, %v37_v3, 0.0  ;;  %v64_v6 = vmul.f32 %v63_v4, %v63_v4  ;;  %57 = vst.msk [vmem:[#allocation5] sm:$0x1] %vm55_vm7, %v464_v31  ;;  %v389_v32 = vld [vmem:[%s538_s2] ss:$0 sm:$0xff] }
   0x8   :  { %40 = vadd.xlane.f32.xlu0 %v39_v5  ;;  %61 = vst.msk [vmem:[#allocation8] sm:$0x1] %vm58_vm11, %v464_v31 }
   0x9   :  { %v66_v7 = vsel %vm38_vm0, %v64_v6, 0.0  ;;  %59 = vst.msk [vmem:[#allocation6] sm:$0x1] %vm58_vm11, %v464_v31 }
   0xa   :  { %60 = vst.msk [vmem:[#allocation7] sm:$0x1] %vm58_vm11, %v464_v31 }
   0xb   :  { %62 = vst.msk [vmem:[#allocation9] sm:$0x1] %vm58_vm11, %v464_v31 }
   0xd   :  { %v156_v62 = vld [vmem:[#allocation4] sm:$0x1] }
   0xe   :  { %v190_v0 = vld [vmem:[#allocation5] sm:$0x1] }
  0x10   :  { %67 = vadd.xlane.f32.xlu0 %v66_v7 }
  0x78   :  { %v206_v37 = vpop.permute.xlu1 %205 }
  0x79   :  { %vm208_vm8 = vcmp.eq.s32.totalorder %v206_v37, %v389_v32 }
  0x7b   :  { %v41_v8 = vpop.xlane.xlu0 %40 }
  0x7c   :  { %v42_v9 = vmax.f32 %v41_v8, 1e-24 }
  0x7e   :  { %390 = vrsqrt.f32 %v42_v9  ;;  %vm49_vm2 = vweird.f32 %v42_v9 }
  0x83   :  { %v68_v10 = vpop.xlane.xlu0 %67 }
  0x84   :  { %v391_v11 = vpop.eup %390  ;;  %v69_v12 = vmax.f32 %v68_v10, 1e-24 }
  0x85   :  { %v44_v13 = vmul.f32 %v391_v11, %v42_v9  ;;  %vm50_vm1 = vweird.f32 %v391_v11 }
  0x86   :  { %392 = vrsqrt.f32 %v69_v12  ;;  %vm51_vm3 = vmor %vm49_vm2, %vm50_vm1  ;;  %vm76_vm5 = vweird.f32 %v69_v12 }
  0x87   :  { %v45_v14 = vmul.f32 %v391_v11, %v44_v13 }
  0x89   :  { %v46_v15 = vmul.f32 0.5, %v45_v14 }
  0x8b   :  { %v47_v16 = vsub.f32 1.5, %v46_v15 }
  0x8c   :  { %v393_v17 = vpop.eup %392 }
  0x8d   :  { %v48_v18 = vmul.f32 %v391_v11, %v47_v16  ;;  %v71_v19 = vmul.f32 %v393_v17, %v69_v12  ;;  %vm77_vm4 = vweird.f32 %v393_v17 }
  0x8e   :  { %vm78_vm6 = vmor %vm76_vm5, %vm77_vm4 }
  0x8f   :  { %v52_v20 = vsel %vm51_vm3, %v391_v11, %v48_v18  ;;  %v72_v21 = vmul.f32 %v393_v17, %v71_v19  ;;  %vm341_vm3 = vcmask 24576  }
  0x90   :  { %v53_v22 = vmul.f32 %v52_v20, %v36_v1 }
  0x91   :  { %v73_v23 = vmul.f32 0.5, %v72_v21 }
  0x92   :  { %54 = vst.msk [vmem:[#allocation2] sm:$0xff] %vm38_vm0, %v53_v22 }
  0x93   :  { %v74_v24 = vsub.f32 1.5, %v73_v23 }
  0x95   :  { %v75_v25 = vmul.f32 %v393_v17, %v74_v24 }
  0x97   :  { %v79_v26 = vsel %vm78_vm6, %v393_v17, %v75_v25 }
  0x98   :  { %v80_v27 = vmul.f32 %v79_v26, %v63_v4 }
  0x99   :  { %v81_v28 = vld [vmem:[#allocation2] sm:$0xff] }
  0x9a   :  { %365 = vmatpush.xpose.msk.msra.mxu0 %vm38_vm0, %v81_v28  ;;  %v111_v29 = vmul.f32 %v81_v28, %v80_v27 }
  0x9c   :  { %v112_v30 = vsel %vm38_vm0, %v111_v29, 0.0 }
  0x9d   :  { %113 = vadd.xlane.f32.xlu1 %v112_v30  ;;  %366 = vmatmul.msk.f32.vlgmr.msra.gmra.mxu0 %vm38_vm0, %v80_v27 }
 0x110   :  { %v114_v56 = vpop.xlane.xlu1 %113 }
 0x111   :  { %v117_v61 = vsel %vm116_vm10, %v114_v56, 0.0  ;;  %v213_v4 = vmul.f32 2.0, %v114_v56 }
 0x113   :  { %v214_v5 = vsub.f32 2.0, %v213_v4 }
 0x115   :  { %v215_v6 = vmax.f32 %v214_v5, 0.0 }
 0x117   :  { %vm223_vm12 = vcmp.eq.f32.partialorder %v215_v6, inf  ;;  %vm225_vm14 = vcmp.eq.f32.partialorder %v215_v6, 0.0 }
 0x11a   :  { %v105_v33 = vpop.f32.mrf.mxu0 }
 0x11b   :  { %v131_v34 = vmul.f32 14.285714, %v105_v33  ;;  %v166_v35 = vmul.f32 10.0, %v105_v33  ;;  %v199_v36 = vmul.f32 2.0, %v105_v33 }
 0x11d   :  { %v367_v38 = vadd.f32 -14.285714, %v131_v34  ;;  %v368_v39 = vadd.f32 -10.0, %v166_v35  ;;  %v200_v40 = vsub.f32 2.0, %v199_v36  ;;  %v226_v35 = vand.u32 2147483648, %v215_v6 }
 0x11f   :  { %v133_v41 = vmul.f32 1.442695, %v367_v38  ;;  %v168_v42 = vmul.f32 1.442695, %v368_v39  ;;  %v201_v43 = vmax.f32 %v200_v40, 0.0 }
 0x121   :  { %394 = vpow2.f32 %v133_v41  ;;  %v209_v44 = vsel %vm208_vm8, 1e+30, %v201_v43 }
 0x122   :  { %396 = vpow2.f32 %v168_v42  ;;  %v210_v45 = vsel %vm135_vm9, %v209_v44, inf }
 0x123   :  { %211 = vmin.xlane.f32.xlu2 %v210_v45  ;;  %398 = vrsqrt.f32 %v215_v6 }
 0x127   :  { %v395_v46 = vpop.eup %394 }
 0x128   :  { %v397_v47 = vpop.eup %396  ;;  %v136_v48 = vsel %vm135_vm9, %v395_v46, 0.0 }
 0x129   :  { %v170_v49 = vsel %vm135_vm9, %v397_v47, 0.0  ;;  %v157_v50 = vrot.slane %v136_v48, 4  ;;  %v399_v7 = vpop.eup %398 }
 0x12a   :  { %171 = vadd.xlane.f32.xlu0 %v170_v49  ;;  %v191_v51 = vrot.slane %v170_v49, 4  ;;  %v217_v8 = vmul.f32 %v399_v7, %v215_v6 }
 0x12b   :  { %137 = vadd.xlane.f32.xlu2 %v136_v48  ;;  %v158_v52 = vadd.f32 %v157_v50, %v136_v48 }
 0x12c   :  { %v192_v53 = vadd.f32 %v191_v51, %v170_v49  ;;  %v218_v9 = vmul.f32 %v399_v7, %v217_v8 }
 0x12d   :  { %v159_v54 = vrot.slane %v158_v52, 2 }
 0x12e   :  { %v193_v55 = vrot.slane %v192_v53, 2  ;;  %v219_v11 = vmul.f32 0.5, %v218_v9 }
 0x12f   :  { %v160_v57 = vadd.f32 %v159_v54, %v158_v52 }
 0x130   :  { %v194_v58 = vadd.f32 %v193_v55, %v192_v53  ;;  %v220_v13 = vsub.f32 1.5, %v219_v11 }
 0x131   :  { %v161_v59 = vrot.slane %v160_v57, 1 }
 0x132   :  { %v195_v60 = vrot.slane %v194_v58, 1  ;;  %v221_v18 = vmul.f32 %v399_v7, %v220_v13 }
 0x133   :  { %v162_v63 = vadd.f32 %v161_v59, %v160_v57  ;;  %118 = vadd.xlane.f32.xlu2 %v117_v61  ;;  %v115_v59 = vld [vmem:[#allocation8] sm:$0x1] }
 0x134   :  { %v196_v1 = vadd.f32 %v195_v60, %v194_v58  ;;  %v222_v22 = vmul.f32 %v221_v18, %v215_v6 }
 0x135   :  { %v163_v2 = vadd.f32 %v162_v63, %v156_v62 }
 0x136   :  { %v197_v3 = vadd.f32 %v196_v1, %v190_v0  ;;  %v224_v34 = vsel %vm223_vm12, %v215_v6, %v222_v22 }
 0x137   :  { %165 = vst.msk [vmem:[#allocation4] sm:$0x1] %vm55_vm7, %v163_v2  ;;  %v227_v44 = vsel %vm225_vm14, %v226_v35, %v224_v34  ;;  %v142_v34 = vld [vmem:[#allocation6] sm:$0x1]  ;;  %v176_v35 = vld [vmem:[#allocation7] sm:$0x1] }
 0x138   :  { %198 = vst.msk [vmem:[#allocation5] sm:$0x1] %vm55_vm7, %v197_v3 }
 0x13e   :  { %v263_v12 = vld [vmem:[#allocation4] sm:$0x1] }
 0x13f   :  { %v267_v27 = vld [vmem:[#allocation5] sm:$0x1] }
 0x196   :  { %v212_v10 = vpop.xlane.xlu2 %211 }
 0x197   :  { %400 = vrsqrt.f32 %v212_v10  ;;  %vm235_vm13 = vcmp.eq.f32.partialorder %v212_v10, inf  ;;  %v238_v40 = vand.u32 2147483648, %v212_v10  ;;  %vm237_vm15 = vcmp.eq.f32.partialorder %v212_v10, 0.0 }
 0x198   :  { %402 = vlog2.f32 %v263_v12 }
 0x19d   :  { %v401_v14 = vpop.eup %400  ;;  %v172_v15 = vpop.xlane.xlu0 %171 }
 0x19e   :  { %v229_v16 = vmul.f32 %v401_v14, %v212_v10  ;;  %404 = vlog2.f32 %v172_v15  ;;  %v138_v17 = vpop.xlane.xlu2 %137  ;;  %v403_v21 = vpop.eup %402 }
 0x19f   :  { %406 = vlog2.f32 %v138_v17  ;;  %v265_v37 = vmul.f32 0.6931472, %v403_v21 }
 0x1a0   :  { %v230_v19 = vmul.f32 %v401_v14, %v229_v16  ;;  %408 = vlog2.f32 %v267_v27 }
 0x1a1   :  { %v266_v47 = vadd.f32 14.285714, %v265_v37 }
 0x1a2   :  { %v231_v20 = vmul.f32 0.5, %v230_v19 }
 0x1a3   :  { %v275_v53 = vsel %vm55_vm7, %v266_v47, 0.0 }
 0x1a4   :  { %v405_v23 = vpop.eup %404  ;;  %v232_v24 = vsub.f32 1.5, %v231_v20 }
 0x1a5   :  { %v407_v25 = vpop.eup %406  ;;  %v174_v26 = vmul.f32 0.6931472, %v405_v23 }
 0x1a6   :  { %v140_v28 = vmul.f32 0.6931472, %v407_v25  ;;  %v119_v29 = vpop.xlane.xlu2 %118  ;;  %v233_v30 = vmul.f32 %v401_v14, %v232_v24  ;;  %v409_v49 = vpop.eup %408 }
 0x1a7   :  { %v120_v32 = vrot.slane %v119_v29, 4  ;;  %v175_v33 = vadd.f32 10.0, %v174_v26  ;;  %v269_v56 = vmul.f32 0.6931472, %v409_v49 }
 0x1a8   :  { %v141_v36 = vadd.f32 14.285714, %v140_v28  ;;  %v234_v31 = vmul.f32 %v233_v30, %v212_v10 }
 0x1a9   :  { %v121_v38 = vadd.f32 %v120_v32, %v119_v29  ;;  %v177_v39 = vsel %vm116_vm10, %v175_v33, 0.0  ;;  %v270_v57 = vadd.f32 10.0, %v269_v56 }
 0x1aa   :  { %178 = vadd.xlane.f32.xlu2 %v177_v39  ;;  %v143_v41 = vsel %vm116_vm10, %v141_v36, 0.0  ;;  %v236_v42 = vsel %vm235_vm13, %v212_v10, %v234_v31  ;;  %v240_v39 = vld [vmem:[#allocation9] sm:$0x1] }
 0x1ab   :  { %v122_v43 = vrot.slane %v121_v38, 2  ;;  %144 = vadd.xlane.f32.xlu0 %v143_v41  ;;  %v239_v45 = vsel %vm237_vm15, %v238_v40, %v236_v42  ;;  %v287_v58 = vsel %vm55_vm7, %v270_v57, 0.0 }
 0x1ac   :  { %v241_v46 = vsub.f32 %v227_v44, %v239_v45 }
 0x1ad   :  { %v123_v48 = vadd.f32 %v122_v43, %v121_v38 }
 0x1ae   :  { %v242_v50 = vadd.f32 0.3, %v241_v46 }
 0x1af   :  { %v124_v51 = vrot.slane %v123_v48, 1 }
 0x1b0   :  { %v243_v52 = vmax.f32 %v242_v50, 0.0 }
 0x1b1   :  { %v125_v54 = vadd.f32 %v124_v51, %v123_v48 }
 0x1b2   :  { %276 = vadd.xlane.f32.xlu2 %v275_v53  ;;  %v244_v55 = vsel %vm116_vm10, %v243_v52, 0.0 }
 0x1b3   :  { %245 = vadd.xlane.f32.xlu0 %v244_v55  ;;  %370 = vpush %v125_v54 }
 0x1bb   :  { %288 = vadd.xlane.f32.xlu0 %v287_v58 }
 0x1e4   :  { %s371_s2 = spop %370 }
 0x1e5   :  { %v127_v60 = vstv %s371_s2 }
 0x1e6   :  { %v128_v61 = vadd.f32 %v127_v60, %v115_v59 }
 0x1e8   :  { %130 = vst.msk [vmem:[#allocation8] sm:$0x1] %vm58_vm11, %v128_v61 }
 0x1ef   :  { %v260_v40 = vld [vmem:[#allocation8] sm:$0x1] }
 0x1f0   :  { %v261_v43 = vmul.f32 14.285714, %v260_v40  ;;  %v262_v50 = vmul.f32 10.0, %v260_v40 }
 0x21d   :  { %v179_v62 = vpop.xlane.xlu2 %178 }
 0x21e   :  { %v180_v63 = vrot.slane %v179_v62, 4  ;;  %v145_v0 = vpop.xlane.xlu0 %144 }
 0x21f   :  { %v146_v1 = vrot.slane %v145_v0, 4 }
 0x220   :  { %v181_v2 = vadd.f32 %v180_v63, %v179_v62 }
 0x221   :  { %v147_v3 = vadd.f32 %v146_v1, %v145_v0  ;;  %v309_v0 = vlaneseq }
 0x222   :  { %v182_v4 = vrot.slane %v181_v2, 2 }
 0x223   :  { %v148_v5 = vrot.slane %v147_v3, 2  ;;  %v310_v1 = vand.u32 127, %v309_v0 }
 0x224   :  { %v183_v6 = vadd.f32 %v182_v4, %v181_v2 }
 0x225   :  { %v277_v7 = vpop.xlane.xlu2 %276  ;;  %v149_v8 = vadd.f32 %v148_v5, %v147_v3  ;;  %vm313_vm0 = vcmp.eq.s32.totalorder %v310_v1, 2  ;;  %vm312_vm1 = vcmp.eq.s32.totalorder %v310_v1, 1  ;;  %vm311_vm2 = vcmp.eq.s32.totalorder %v310_v1, 0 }
 0x226   :  { %v278_v9 = vrot.slane %v277_v7, 4  ;;  %v246_v10 = vpop.xlane.xlu0 %245  ;;  %v184_v11 = vrot.slane %v183_v6, 1 }
 0x227   :  { %v247_v12 = vrot.slane %v246_v10, 4  ;;  %v150_v13 = vrot.slane %v149_v8, 1 }
 0x228   :  { %v279_v14 = vadd.f32 %v278_v9, %v277_v7  ;;  %v185_v18 = vadd.f32 %v184_v11, %v183_v6 }
 0x229   :  { %v248_v15 = vadd.f32 %v247_v12, %v246_v10  ;;  %v151_v16 = vadd.f32 %v150_v13, %v149_v8 }
 0x22a   :  { %v280_v17 = vrot.slane %v279_v14, 2 }
 0x22b   :  { %v249_v19 = vrot.slane %v248_v15, 2  ;;  %372 = vpush %v151_v16 }
 0x22c   :  { %374 = vpush %v185_v18  ;;  %v281_v20 = vadd.f32 %v280_v17, %v279_v14 }
 0x22d   :  { %v250_v21 = vadd.f32 %v249_v19, %v248_v15 }
 0x22e   :  { %v289_v22 = vpop.xlane.xlu0 %288  ;;  %v282_v23 = vrot.slane %v281_v20, 1 }
 0x22f   :  { %v290_v24 = vrot.slane %v289_v22, 4  ;;  %v251_v25 = vrot.slane %v250_v21, 1 }
 0x230   :  { %v283_v28 = vadd.f32 %v282_v23, %v281_v20 }
 0x231   :  { %v291_v26 = vadd.f32 %v290_v24, %v289_v22  ;;  %v252_v27 = vadd.f32 %v251_v25, %v250_v21 }
 0x233   :  { %v292_v29 = vrot.slane %v291_v26, 2  ;;  %376 = vpush %v252_v27 }
 0x234   :  { %378 = vpush %v283_v28 }
 0x235   :  { %v293_v30 = vadd.f32 %v292_v29, %v291_v26 }
 0x237   :  { %v294_v32 = vrot.slane %v293_v30, 1 }
 0x239   :  { %v295_v33 = vadd.f32 %v294_v32, %v293_v30 }
 0x23b   :  { %380 = vpush %v295_v33 }
 0x25c   :  { %s373_s23 = spop %372 }
 0x25d   :  { %v153_v36 = vstv %s373_s23  ;;  %s375_s24 = spop %374 }
 0x25e   :  { %v154_v37 = vadd.f32 %v153_v36, %v142_v34  ;;  %v187_v31 = vstv %s375_s24 }
 0x25f   :  { %v188_v38 = vadd.f32 %v187_v31, %v176_v35 }
 0x260   :  { %155 = vst.msk [vmem:[#allocation6] sm:$0x1] %vm58_vm11, %v154_v37 }
 0x261   :  { %189 = vst.msk [vmem:[#allocation7] sm:$0x1] %vm58_vm11, %v188_v38 }
 0x264   :  { %s377_s25 = spop %376 }
 0x265   :  { %v254_v41 = vstv %s377_s25  ;;  %s379_s26 = spop %378 }
 0x266   :  { %v255_v42 = vadd.f32 %v254_v41, %v240_v39  ;;  %v285_v45 = vstv %s379_s26 }
 0x267   :  { %v271_v44 = vld [vmem:[#allocation6] sm:$0x1]  ;;  %v286_v47 = vsub.f32 %v285_v45, %v261_v43 }
 0x268   :  { %256 = vst.msk [vmem:[#allocation9] sm:$0x1] %vm58_vm11, %v255_v42  ;;  %v272_v46 = vsub.f32 %v271_v44, %v261_v43  ;;  %v273_v48 = vld [vmem:[#allocation7] sm:$0x1] }
 0x269   :  { %v274_v52 = vsub.f32 %v273_v48, %v262_v50 }
 0x26a   :  { %v299_v49 = vadd.f32 %v286_v47, %v272_v46 }
 0x26c   :  { %s381_s27 = spop %380  ;;  %v300_v55 = vmul.f32 0.5, %v299_v49 }
 0x26d   :  { %v297_v51 = vstv %s381_s27 }
 0x26e   :  { %v298_v53 = vsub.f32 %v297_v51, %v262_v50  ;;  %v301_v60 = vmul.f32 0.125, %v300_v55 }
 0x26f   :  { %v305_v54 = vld [vmem:[#allocation9] sm:$0x1] }
 0x270   :  { %v302_v56 = vadd.f32 %v298_v53, %v274_v52  ;;  %v306_v57 = vmul.f32 0.125, %v305_v54 }
 0x272   :  { %v303_v58 = vmul.f32 0.5, %v302_v56  ;;  %316 = vperm.xlu2 %387, %v306_v57  }
 0x274   :  { %v304_v59 = vmul.f32 0.125, %v303_v58 }
 0x276   :  { %329 = vperm.xlu1 %386, %v304_v59   ;;  %v307_v61 = vadd.f32 %v304_v59, %v301_v60 }
 0x278   :  { %v308_v62 = vadd.f32 %v307_v61, %v306_v57 }
 0x27a   :  { %336 = vperm.xlu2 %387, %v301_v60   ;;  %322 = vperm.xlu0 %388, %v308_v62  }
 0x2cc   :  { %v317_v63 = vpop.permute.xlu2 %316 }
 0x2cd   :  { %v319_v5 = vperm.slane %v317_v63, 0 }
 0x2d4   :  { %v337_v3 = vpop.permute.xlu2 %336 }
 0x2d5   :  { %v339_v8 = vperm.slane %v337_v3, 0 }
 0x2e8   :  { %v330_v2 = vpop.permute.xlu1 %329 }
 0x2e9   :  { %v332_v7 = vperm.slane %v330_v2, 0 }
 0x2ec   :  { %v323_v4 = vpop.permute.xlu0 %322 }
 0x2ed   :  { %v325_v6 = vperm.slane %v323_v4, 0 }
 0x2ef   :  { %v326_v9 = vsel %vm313_vm0, %v319_v5, %v325_v6 }
 0x2f0   :  { %v333_v10 = vsel %vm312_vm1, %v332_v7, %v326_v9 }
 0x2f1   :  { %v340_v11 = vsel %vm311_vm2, %v339_v8, %v333_v10 }
 0x2f2   :  { %342 = vst.msk [vmem:[#allocation10] sm:$0x1] %vm341_vm3, %v340_v11 }
 0x2f3   :  { %353 = dma.vmem_to_hbm [thread:$0]  %s349_s29, 16, %s351_s6, [#allocation11]  }
 0x2f4   :  { %460 = dma.done.wait [#allocation11], 16  }
 0x2f5   :  { %461 = vsyncadd [#allocation11], 4294967280 }
 0x2f6   :  { %358 = vsyncpa [#allocation11], 1 }
 0x2f7   :  { %359 = vsyncmov [#allocation3] }
 0x2fa   :  { %s360_s7 = vpop.sfrf %359 }
 0x2fb   :  { %p369_p0 = scmp.ne.s32.totalorder %s360_s7, 0 }
 0x2fd   :  { %364 = shalt.err (%p369_p0)  }

</bundles_post_ra>
